<compile_context>
chip_gen: v5e
topology: v5e:2x2
jax: 0.10.0
libtpu: 0.0.40
codegen_flags: <defaults>
</compile_context>

<pallas_src>
import functools
import math

import jax
import jax.numpy as jnp
from jax import lax
from jax.experimental import pallas as pl
from jax.experimental.pallas import tpu as pltpu

# Constants from the PyTorch module.
EPS = -1e-8          # the torch file defines EPS = -1e-08 (negative)
MASK = -1.0
L2_EPS = 1e-8        # eps used inside l2norm(X, dim)


def _cdiv(a, b):
    return -(-a // b)


def _round_up(x, k):
    return _cdiv(x, k) * k


def _vsa_kernel(lens_ref, capsT_ref, imgs_ref, out_ref, *, inv_temp):
    """One grid step = one image tile x one caption tile.

    lens_ref  : (TN, 1)  int32   valid-region counts for this image tile
    capsT_ref : (1, D, M)        transposed caption-word slab, M = TC * Wpad
                                 (padded words are zeroed in the wrapper)
    imgs_ref  : (TN, R, D)       image region features (R padded to a mult. of 8)
    out_ref   : (TN, M)  f32     per (image, caption-word) similarity
    """
    tn, rpad, d = imgs_ref.shape
    m = capsT_ref.shape[2]

    capsT = capsT_ref[0]                                   # (D, M), native dtype
    imgs = imgs_ref[...]                                   # (TN, R, D), native dtype

    # --- one fat MXU matmul for the whole image tile: (TN*R, D) @ (D, M) -----
    s_raw = lax.dot_general(
        imgs.reshape(tn * rpad, d), capsT,
        dimension_numbers=(((1,), (0,)), ((), ())),
        preferred_element_type=jnp.float32).reshape(tn, rpad, m)

    # --- region-validity mask (TN, R, 1) --------------------------------------
    r_iota = lax.broadcasted_iota(jnp.int32, (tn, rpad, 1), 1)
    rvalid = r_iota < lens_ref[...].reshape(tn, 1, 1)

    # --- LeakyReLU(0.1) + region mask + l2norm over regions -------------------
    s = jnp.where(s_raw > 0, s_raw, 0.1 * s_raw)
    s = jnp.where(rvalid, s, 0.0)
    # l2norm: X * rsqrt(sum X^2 + eps^2) ~= X / (||X|| + eps); differs from the
    # torch form only for near-zero columns (padded words), later MASK-filled.
    s = s * lax.rsqrt(jnp.sum(s * s, axis=1, keepdims=True) + L2_EPS * L2_EPS)

    # --- softmax over regions.  Max-subtraction is skipped on purpose: after
    # the l2norm |s| <= 1, so |s * inv_temp| <= inv_temp (asserted <= 80 in the
    # wrapper) and exp() cannot overflow in f32.
    e = jnp.where(rvalid, jnp.exp(s * inv_temp), 0.0)
    denom = jnp.sum(e, axis=1, keepdims=True)
    soft = e * pl.reciprocal(denom + 1e-30, approx=True)   # fully-padded rows -> 0

    # --- numerator: <caps_w, wctx_w> = sum_r soft[r,w] * s_raw[r,w] ----------
    num = jnp.sum(soft * s_raw, axis=1)                    # (TN, M)

    # --- ||wctx_w||^2 = soft_w^T G soft_w with G = imgs @ imgs^T per image.
    # Avoids materializing the (D, M) attended context entirely.
    gram = jnp.einsum('nrd,nsd->nrs', imgs, imgs,
                      preferred_element_type=jnp.float32)  # (TN, R, R)
    gs = jnp.einsum('nrs,nsm->nrm', gram, soft,
                    preferred_element_type=jnp.float32)    # (TN, R, M)
    wnorm2 = jnp.maximum(jnp.sum(soft * gs, axis=1), 0.0)  # clamp fp error >= 0

    # Exact divide for the final normalization (tiny (TN, M) op).
    out_ref[...] = num / (jnp.sqrt(wnorm2) + EPS)


def _vmem_budget_bytes():
    try:
        return int(pltpu.get_tpu_info().vmem_capacity_bytes * 0.85)
    except Exception:                       # pragma: no cover - conservative fallback
        return int(64 * 1024 * 1024 * 0.85)  # v7x has the smallest physical VMEM


def vsa_coding(imgs, caps, img_lens, cap_lens, temperature=0.1,
               cap_tile=64, img_tile=8):
    """Pallas-TPU forward of VSACoding. Returns (n_image, n_caption, max_w) f32."""
    imgs = jnp.asarray(imgs)
    caps = jnp.asarray(caps)
    img_lens = jnp.asarray(img_lens).astype(jnp.int32)
    cap_lens = jnp.asarray(cap_lens).astype(jnp.int32)

    n_img, _, d = imgs.shape
    n_cap = caps.shape[0]
    assert caps.shape[2] == d

    inv_temp = float(1.0 / temperature)
    # exp() in the kernel runs without max-subtraction; the l2norm bounds the
    # logits by inv_temp, which must stay well below the f32 exp overflow (~88).
    assert inv_temp <= 80.0, "temperature too small for the no-max-sub softmax"

    # torch: truncate to the longest real sequence lengths.
    # TODO(synk): int(lens.max()) is a host sync, exactly like the torch forward.
    max_r = int(img_lens.max())
    max_w = int(cap_lens.max())
    imgs = imgs[:, :max_r, :]
    caps = caps[:, :max_w, :]

    # torch: caps.masked_fill(cap_mask == 0, 0) -- lets the kernel skip the word mask.
    wmask = jnp.arange(max_w, dtype=jnp.int32)[None, :] < cap_lens[:, None]   # (n_cap, W)
    caps = caps * wmask[..., None].astype(caps.dtype)

    # ---------------- tiling under a generation-aware VMEM budget -------------
    rpad = _round_up(max_r, 8)                 # sublane-aligned regions
    itemsize = imgs.dtype.itemsize
    budget = _vmem_budget_bytes()

    def img_tiling(tile):
        if n_img <= tile:
            return n_img, 1
        t = max(8, _round_up(tile, 8))
        return t, _cdiv(n_img, t)

    def cap_tiling(tile):
        tc = n_cap if n_cap <= tile else tile
        n_ct = _cdiv(n_cap, tc)
        # When the caption axis is tiled, the output block's lane dim M = tc*wpad
        # must be a multiple of 128 (lane-dense, unmasked stores).
        lane_align = 128 // math.gcd(tc, 128)
        wpad = _round_up(max_w, lane_align) if n_ct > 1 else max_w
        return tc, n_ct, wpad

    def estimate(tn_, tc_, wpad_):
        m_ = tc_ * wpad_
        return (d * m_ * itemsize * 2                # caption slab (double buffered)
                + tn_ * rpad * d * itemsize * 2      # image tile
                + tn_ * m_ * 4 * 2                   # output tile
                + 5 * tn_ * rpad * m_ * 4            # f32 temporaries (s_raw/s/soft/gs/..)
                + tn_ * rpad * rpad * 4              # per-image Gram
                + (2 << 20))                         # slack

    img_tile_try, cap_tile_try = img_tile, cap_tile
    tn, n_it = img_tiling(img_tile_try)
    tc, n_ct, wpad = cap_tiling(cap_tile_try)

    # v7x megacore: make sure the grid has >= 2 steps to shard across the 2 TCs.
    if n_it * n_ct == 1 and n_img >= 16:
        img_tile_try = _round_up(_cdiv(n_img, 2), 8)
        tn, n_it = img_tiling(img_tile_try)

    while estimate(tn, tc, wpad) > budget:
        if cap_tile_try > 8:
            cap_tile_try = max(8, cap_tile_try // 2)
            tc, n_ct, wpad = cap_tiling(cap_tile_try)
        elif img_tile_try > 8:
            img_tile_try = max(8, img_tile_try // 2)
            tn, n_it = img_tiling(img_tile_try)
        else:
            break

    m = tc * wpad
    n_cap_pad = tc * n_ct
    n_img_pad = tn * n_it

    # ---------------- build the padded, lane-dense operand slabs --------------
    caps_p = caps
    if wpad > max_w or n_cap_pad > n_cap:
        caps_p = jnp.pad(caps, ((0, n_cap_pad - n_cap), (0, wpad - max_w), (0, 0)))
    # (n_ct, D, TC*Wpad): D on sublanes, caption-words lane-dense.
    caps_t = jnp.reshape(
        jnp.transpose(jnp.reshape(caps_p, (n_ct, tc, wpad, d)), (0, 3, 1, 2)),
        (n_ct, d, m))

    imgs_p = imgs
    if rpad > max_r or n_img_pad > n_img:
        imgs_p = jnp.pad(imgs, ((0, n_img_pad - n_img), (0, rpad - max_r), (0, 0)))
    lens_p = jnp.pad(img_lens, (0, n_img_pad - n_img)).reshape(n_img_pad, 1)

    est = estimate(tn, tc, wpad)
    compiler_kwargs = dict(
        dimension_semantics=("parallel", "parallel"),
        # Always set the scoped-VMEM limit (v5e default is only 16 MiB) and cap
        # it by ~85% of this generation's physical VMEM.
        vmem_limit_bytes=int(min(budget, max(est, 32 * 1024 * 1024))),
    )

    kernel = functools.partial(_vsa_kernel, inv_temp=inv_temp)

    out2 = pl.pallas_call(
        kernel,
        out_shape=jax.ShapeDtypeStruct((n_img_pad, n_ct * m), jnp.float32),
        grid_spec=pltpu.PrefetchScalarGridSpec(
            num_scalar_prefetch=0,
            grid=(n_it, n_ct),          # caption tiles innermost -> imgs fetched once per ii
            in_specs=[
                pl.BlockSpec((tn, 1), lambda ii, ci: (ii, 0)),          # region counts
                pl.BlockSpec((1, d, m), lambda ii, ci: (ci, 0, 0)),     # caption slab
                pl.BlockSpec((tn, rpad, d), lambda ii, ci: (ii, 0, 0)),  # image tile
            ],
            out_specs=pl.BlockSpec((tn, m), lambda ii, ci: (ii, ci)),
        ),
        compiler_params=pltpu.CompilerParams(**compiler_kwargs),
    )(lens_p, caps_t, imgs_p)

    # (n_img_pad, n_cap_pad*Wpad) -> (n_img, n_cap, max_w): pure reshape, no transpose.
    out = out2.reshape(n_img_pad, n_cap_pad, wpad)[:n_img, :n_cap, :max_w]
    # torch: final masked_fill(word mask == 0, MASK), already image-major here.
    out = jnp.where(wmask[None, :, :], out, MASK)
    return out


def _reference(imgs, caps, img_lens, cap_lens, temperature=0.1):
    """Pure-JAX transcription of VSACoding.forward (torch)."""
    neg_inf = float("-inf")
    max_r = int(img_lens.max())
    max_w = int(cap_lens.max())
    imgs = imgs[:, :max_r, :].astype(jnp.float32)
    caps = caps[:, :max_w, :].astype(jnp.float32)

    wmask = jnp.arange(max_w)[None, :] < cap_lens[:, None]      # (n_cap, W)
    rmask = jnp.arange(max_r)[None, :] < img_lens[:, None]      # (n_img, R)
    mask = wmask[:, None, :, None] & rmask[None, :, None, :]    # (n_cap, n_img, W, R)

    sims = jnp.einsum('iwd,jrd->ijwr', caps, imgs)              # get_fgsims
    imgs_m = imgs * rmask[..., None]                            # masked_fill(img_mask==0, 0)
    caps_m = caps * wmask[..., None]                            # masked_fill(cap_mask==0, 0)

    sims = jnp.where(sims > 0, sims, 0.1 * sims)                # LeakyReLU(0.1)
    sims = jnp.where(mask, sims, 0.0)
    sims = sims / (jnp.sqrt(jnp.sum(sims ** 2, axis=-1, keepdims=True)) + L2_EPS)
    sims = sims / temperature
    sims = jnp.where(mask, sims, neg_inf)
    sims = jax.nn.softmax(sims, axis=-1)
    sims = jnp.where(mask, sims, 0.0)                           # clears NaN of empty rows
    wctx = jnp.einsum('ijwr,jrd->ijwd', sims, imgs_m)
    num = jnp.sum(wctx * caps_m[:, None, :, :], axis=-1)
    wnorm = jnp.sqrt(jnp.sum(wctx ** 2, axis=-1))
    out = num / (wnorm + EPS)
    out = jnp.where(wmask[:, None, :], out, MASK)
    return jnp.transpose(out, (1, 0, 2))                        # (n_img, n_cap, W)


if __name__ == "__main__":
    key = jax.random.PRNGKey(0)
    k_img, k_cap = jax.random.split(key)

    n_image, n_regions, d = 2, 16, 32
    n_caption, max_n_word = 3, 8

    imgs = jax.random.normal(k_img, (n_image, n_regions, d), dtype=jnp.float32)
    caps = jax.random.normal(k_cap, (n_caption, max_n_word, d), dtype=jnp.float32)
    img_lens = jnp.array([14, 11], dtype=jnp.int32)   # exercises region slicing/masking
    cap_lens = jnp.array([5, 8, 3], dtype=jnp.int32)  # exercises word masking

    out = vsa_coding(imgs, caps, img_lens, cap_lens, temperature=0.1)
    out = jax.block_until_ready(out)

    ref = _reference(imgs, caps, img_lens, cap_lens, temperature=0.1)

    assert out.shape == (n_image, n_caption, int(cap_lens.max())), out.shape
    assert bool(jnp.all(jnp.isfinite(out)))
    # only the softmax denominator uses the approx EUP reciprocal (its error
    # cancels in the final num/||wctx|| ratio); the final divide is exact.
    assert jnp.allclose(out, ref, atol=2e-2, rtol=2e-2), (out, ref)

    print("KERNEL_OK")
</pallas_src>

<mosaic_0001>
module attributes {stable_mosaic.version = 11 : i64} {
  func.func @_vsa_kernel(%arg0: i32, %arg1: i32, %arg2: memref<2x1xi32, #tpu.memory_space<vmem>>, %arg3: memref<1x32x24xf32, #tpu.memory_space<vmem>>, %arg4: memref<2x16x32xf32, #tpu.memory_space<vmem>>, %arg5: memref<2x24xf32, #tpu.memory_space<vmem>>) attributes {dimension_semantics = [#tpu.dimension_semantics<parallel>, #tpu.dimension_semantics<parallel>], iteration_bounds = array<i64: 1, 1>, scalar_prefetch = 0 : i64, scratch_operands = 0 : i64, tpu.core_type = #tpu.core_type<tc>, window_params = [{transform_indices = @transform_0, window_bounds = array<i64: 2, 1>}, {transform_indices = @transform_1, window_bounds = array<i64: 1, 32, 24>}, {transform_indices = @transform_2, window_bounds = array<i64: 2, 16, 32>}, {transform_indices = @transform_3, window_bounds = array<i64: 2, 24>}]} {
    %c0 = arith.constant 0 : index
    %c0_0 = arith.constant 0 : index
    %c0_1 = arith.constant 0 : index
    %0 = vector.load %arg3[%c0, %c0_0, %c0_1] : memref<1x32x24xf32, #tpu.memory_space<vmem>>, vector<1x32x24xf32>
    %1 = vector.shape_cast %0 : vector<1x32x24xf32> to vector<32x24xf32>
    %c0_2 = arith.constant 0 : index
    %c0_3 = arith.constant 0 : index
    %c0_4 = arith.constant 0 : index
    %2 = vector.load %arg4[%c0_2, %c0_3, %c0_4] : memref<2x16x32xf32, #tpu.memory_space<vmem>>, vector<2x16x32xf32>
    %3 = vector.shape_cast %2 : vector<2x16x32xf32> to vector<32x32xf32>
    %cst = arith.constant dense<0.000000e+00> : vector<32x24xf32>
    %4 = tpu.matmul %3, %1, %cst {dimension_numbers = #tpu.dot_dimension_numbers<[1], [0], [0], [1], [0, 0, 1, 1], [], []>} : vector<32x32xf32>, vector<32x24xf32>, vector<32x24xf32> -> vector<32x24xf32>
    %5 = vector.shape_cast %4 : vector<32x24xf32> to vector<2x16x24xf32>
    %6 = tpu.iota {dimensions = array<i32: 1>} : vector<2x16x1xi32>
    %c0_5 = arith.constant 0 : index
    %c0_6 = arith.constant 0 : index
    %7 = vector.load %arg2[%c0_5, %c0_6] : memref<2x1xi32, #tpu.memory_space<vmem>>, vector<2x1xi32>
    %8 = vector.shape_cast %7 : vector<2x1xi32> to vector<2x1x1xi32>
    %9 = vector.broadcast %8 : vector<2x1x1xi32> to vector<2x16x1xi32>
    %10 = arith.cmpi slt, %6, %9 : vector<2x16x1xi32>
    %cst_7 = arith.constant 0.000000e+00 : f32
    %11 = vector.broadcast %cst_7 : f32 to vector<2x16x24xf32>
    %12 = arith.cmpf ogt, %5, %11 : vector<2x16x24xf32>
    %cst_8 = arith.constant 1.000000e-01 : f32
    %13 = vector.broadcast %cst_8 : f32 to vector<2x16x24xf32>
    %14 = arith.mulf %13, %5 : vector<2x16x24xf32>
    %15 = arith.select %12, %5, %14 : vector<2x16x24xi1>, vector<2x16x24xf32>
    %cst_9 = arith.constant 0.000000e+00 : f32
    %16 = vector.shape_cast %10 : vector<2x16x1xi1> to vector<2x16x1xi1>
    %17 = vector.broadcast %16 : vector<2x16x1xi1> to vector<2x16x24xi1>
    %18 = vector.broadcast %cst_9 : f32 to vector<2x16x24xf32>
    %19 = arith.select %17, %15, %18 : vector<2x16x24xi1>, vector<2x16x24xf32>
    %20 = arith.mulf %19, %19 : vector<2x16x24xf32>
    %cst_10 = arith.constant dense<0.000000e+00> : vector<2x24xf32>
    %21 = vector.multi_reduction <add>, %20, %cst_10 [1] : vector<2x16x24xf32> to vector<2x24xf32>
    %22 = vector.shape_cast %21 : vector<2x24xf32> to vector<2x1x24xf32>
    %cst_11 = arith.constant 1.000000e-16 : f32
    %23 = vector.broadcast %cst_11 : f32 to vector<2x1x24xf32>
    %24 = arith.addf %22, %23 : vector<2x1x24xf32>
    %25 = math.rsqrt %24 : vector<2x1x24xf32>
    %26 = vector.broadcast %25 : vector<2x1x24xf32> to vector<2x16x24xf32>
    %27 = arith.mulf %19, %26 : vector<2x16x24xf32>
    %cst_12 = arith.constant 1.000000e+01 : f32
    %28 = vector.broadcast %cst_12 : f32 to vector<2x16x24xf32>
    %29 = arith.mulf %27, %28 : vector<2x16x24xf32>
    %30 = math.exp %29 : vector<2x16x24xf32>
    %cst_13 = arith.constant 0.000000e+00 : f32
    %31 = vector.shape_cast %10 : vector<2x16x1xi1> to vector<2x16x1xi1>
    %32 = vector.broadcast %31 : vector<2x16x1xi1> to vector<2x16x24xi1>
    %33 = vector.broadcast %cst_13 : f32 to vector<2x16x24xf32>
    %34 = arith.select %32, %30, %33 : vector<2x16x24xi1>, vector<2x16x24xf32>
    %cst_14 = arith.constant dense<0.000000e+00> : vector<2x24xf32>
    %35 = vector.multi_reduction <add>, %34, %cst_14 [1] : vector<2x16x24xf32> to vector<2x24xf32>
    %36 = vector.shape_cast %35 : vector<2x24xf32> to vector<2x1x24xf32>
    %cst_15 = arith.constant 1.000000e-30 : f32
    %37 = vector.broadcast %cst_15 : f32 to vector<2x1x24xf32>
    %38 = arith.addf %36, %37 : vector<2x1x24xf32>
    %39 = tpu.reciprocal %38 {approx = true} : vector<2x1x24xf32> -> vector<2x1x24xf32>
    %40 = vector.broadcast %39 : vector<2x1x24xf32> to vector<2x16x24xf32>
    %41 = arith.mulf %34, %40 : vector<2x16x24xf32>
    %42 = arith.mulf %41, %5 : vector<2x16x24xf32>
    %cst_16 = arith.constant dense<0.000000e+00> : vector<2x24xf32>
    %43 = vector.multi_reduction <add>, %42, %cst_16 [1] : vector<2x16x24xf32> to vector<2x24xf32>
    "tpu.trace_start"() <{level = 10 : i32, message = "nrd,nsd->nrs"}> : () -> ()
    %cst_17 = arith.constant dense<0.000000e+00> : vector<2x16x16xf32>
    %44 = tpu.matmul %2, %2, %cst_17 {dimension_numbers = #tpu.dot_dimension_numbers<[2], [2], [1], [1], [0, 0, 0, 1, 1, 1], [0], [0]>} : vector<2x16x32xf32>, vector<2x16x32xf32>, vector<2x16x16xf32> -> vector<2x16x16xf32>
    "tpu.trace_stop"() : () -> ()
    "tpu.trace_start"() <{level = 10 : i32, message = "nrs,nsm->nrm"}> : () -> ()
    %cst_18 = arith.constant dense<0.000000e+00> : vector<2x16x24xf32>
    %45 = tpu.matmul %44, %41, %cst_18 {dimension_numbers = #tpu.dot_dimension_numbers<[2], [1], [1], [2], [0, 0, 0, 1, 1, 2], [0], [0]>} : vector<2x16x16xf32>, vector<2x16x24xf32>, vector<2x16x24xf32> -> vector<2x16x24xf32>
    "tpu.trace_stop"() : () -> ()
    %46 = arith.mulf %41, %45 : vector<2x16x24xf32>
    %cst_19 = arith.constant dense<0.000000e+00> : vector<2x24xf32>
    %47 = vector.multi_reduction <add>, %46, %cst_19 [1] : vector<2x16x24xf32> to vector<2x24xf32>
    %cst_20 = arith.constant 0.000000e+00 : f32
    %48 = vector.broadcast %cst_20 : f32 to vector<2x24xf32>
    %49 = arith.maximumf %47, %48 : vector<2x24xf32>
    %50 = math.sqrt %49 : vector<2x24xf32>
    %cst_21 = arith.constant -9.99999993E-9 : f32
    %51 = vector.broadcast %cst_21 : f32 to vector<2x24xf32>
    %52 = arith.addf %50, %51 : vector<2x24xf32>
    %53 = arith.divf %43, %52 : vector<2x24xf32>
    %c0_22 = arith.constant 0 : index
    %c0_23 = arith.constant 0 : index
    %54 = vector.load %arg5[%c0_22, %c0_23] : memref<2x24xf32, #tpu.memory_space<vmem>>, vector<2x24xf32>
    tpu.vector_store %arg5[%c0_22, %c0_23], %53 {strides = array<i32>} : memref<2x24xf32, #tpu.memory_space<vmem>>, vector<2x24xf32>,
    return
  }
  func.func @transform_0(%arg0: i32, %arg1: i32) -> (i32, i32) {
    %c0_i32 = arith.constant 0 : i32
    %c0_i32_0 = arith.constant 0 : i32
    return %arg0, %c0_i32 : i32, i32
  }
  func.func @transform_1(%arg0: i32, %arg1: i32) -> (i32, i32, i32) {
    %c0_i32 = arith.constant 0 : i32
    %c0_i32_0 = arith.constant 0 : i32
    %c0_i32_1 = arith.constant 0 : i32
    return %arg1, %c0_i32, %c0_i32_0 : i32, i32, i32
  }
  func.func @transform_2(%arg0: i32, %arg1: i32) -> (i32, i32, i32) {
    %c0_i32 = arith.constant 0 : i32
    %c0_i32_0 = arith.constant 0 : i32
    %c0_i32_1 = arith.constant 0 : i32
    return %arg0, %c0_i32, %c0_i32_0 : i32, i32, i32
  }
  func.func @transform_3(%arg0: i32, %arg1: i32) -> (i32, i32) {
    %c0_i32 = arith.constant 0 : i32
    return %arg0, %arg1 : i32, i32
  }
}

</mosaic_0001>

<bundles_post_ra>
// kernel: tpu_custom_call.1
= control target key start
LH: loop header
LB: loop body
LE: loop exit
PB: predicated region body
PF: predicated region fallthrough
CT: control target
= control target key end

     0   :  { %v65_v2 = vlaneseq  ;;  %v509_v4 = vmov 0   ;;  %vm23_vm0 = vcmask 261120   ;;  %s647_s0 = inlined_call_operand.vmem [shape: s32[2,1], index: 0, kind: input, shape index: {}]   ;;  %s648_s1 = inlined_call_operand.vmem [shape: f32[1,32,24], index: 1, kind: input, shape index: {}]   ;;  %s649_s2 = inlined_call_operand.vmem [shape: f32[2,16,32], index: 2, kind: input, shape index: {}]   ;;  %s650_s3 = inlined_call_operand.hbm [shape: f32[2,24], index: 3, kind: output, shape index: {}]  }
   0x1   :  { %v18_v0 = vld [vmem:[%s648_s1 + $0x18] sm:$0xff]  ;;  %v17_v1 = vld [vmem:[%s648_s1 + $0x10] sm:$0xff]  ;;  %v16_v3 = vld [vmem:[%s648_s1 + $0x8] sm:$0xff]  ;;  %457 = vset.pattern.permute.xlu0 %v509_v4  ;;  %458 = vset.pattern.permute.xlu1 %v509_v4 }
   0x2   :  { %48 = vmatpush.msra.mxu0 %v18_v0  ;;  %449 = vmatpush.msra.mxu1 %v18_v0  ;;  %v66_v5 = vshrl.u32 %v65_v2, 7  ;;  %v68_v6 = vld [vmem:[%s647_s0] sm:$0x3]  ;;  %v22_v7 = vld [vmem:[%s649_s2 + $0x18] sm:$0xff] }
   0x3   :  { %v70_v8 = vperm.slane %v68_v6, 0  ;;  %v69_v9 = vrot.slane %v68_v6, 1 }
   0x4   :  { %49 = vmatpush.msra.mxu0 %v17_v1  ;;  %450 = vmatpush.msra.mxu1 %v17_v1 }
   0x5   :  { %8 = vsyncpa [#allocation3], 0  ;;  %v15_v10 = vld [vmem:[%s648_s1] sm:$0xff]  ;;  %441 = vmatpush.xpose.msk.msra.mxu2 %vm23_vm0, %v22_v7  ;;  %vm72_vm1 = vcmp.lt.s32.totalorder %v66_v5, %v70_v8  ;;  %v71_v12 = vperm.slane %v69_v9, 0  ;;  %v67_v14 = vadd.s32 8, %v66_v5  ;;  %v20_v16 = vld [vmem:[%s649_s2 + $0x8] sm:$0xff] }
   0x6   :  { %50 = vmatpush.msra.mxu0 %v16_v3  ;;  %v19_v11 = vld [vmem:[%s649_s2] sm:$0xff]  ;;  %451 = vmatpush.msra.mxu1 %v16_v3  ;;  %v88_v13 = vsel %vm72_vm1, 1, %v509_v4  ;;  %v21_v17 = vld [vmem:[%s649_s2 + $0x10] sm:$0xff]  ;;  %vm116_vm10 = vcmask 195584   ;;  %s510_s2 = smov [#allocation2]   ;;  %s424_s4 = sshll.u32 %s650_s3, 4  ;;  %s425_s4 = int_to_ptr.hbm [resolvable:$true] %s424_s4 }
   0x7   :  { %vm74_vm2 = vcmp.lt.s32.totalorder %v66_v5, %v71_v12  ;;  %93 = vperm.xlu0 %457, %v88_v13   ;;  %vm73_vm3 = vcmp.lt.s32.totalorder %v67_v14, %v70_v8  ;;  %vm75_vm4 = vcmp.lt.s32.totalorder %v67_v14, %v71_v12  ;;  %s422_s28 = sshll.u32 %s510_s2, 4  ;;  %s423_s28 = int_to_ptr.vmem [resolvable:$true] %s422_s28 }
   0x8   :  { %51 = vmatpush.msra.mxu0 %v15_v10  ;;  %452 = vmatpush.msra.mxu1 %v15_v10  ;;  %v90_v15 = vsel %vm74_vm2, 1, %v509_v4  ;;  %v89_v18 = vsel %vm73_vm3, 1, %v509_v4  ;;  %v91_v19 = vsel %vm75_vm4, 1, %v509_v4  ;;  %vm271_vm4 = vcmask 130048  }
   0x9   :  { %433 = vmatmul.msk.f32.vlgmr.msra.gmra.mxu0 %vm23_vm0, %v19_v11  ;;  %436 = vmatmul.msk.f32.vlgmr.msra.gmra.mxu1 %vm23_vm0, %v22_v7 }
   0xa   :  { %99 = vperm.xlu1 %458, %v90_v15   ;;  %437 = vmatpush.xpose.msk.msrb.mxu1 %vm23_vm0, %v20_v16 }
   0xb   :  { %442 = vmatpush.xpose.msk.msra.mxu2 %vm23_vm0, %v21_v17 }
   0xe   :  { %443 = vmatmul.msk.f32.vlgmr.msra.gmra.mxu2 %vm23_vm0, %v21_v17  ;;  %438 = vmatpush.xpose.msk.msrb.mxu1 %vm23_vm0, %v19_v11 }
   0xf   :  { %96 = vperm.xlu0 %457, %v89_v18  }
  0x11   :  { %434 = vmatmul.msk.f32.gmra.mxu0 %vm23_vm0, %v20_v16  ;;  %439 = vmatmul.msk.f32.vlgmr.msrb.gmra.mxu1 %vm23_vm0, %v19_v11 }
  0x12   :  { %102 = vperm.xlu1 %458, %v91_v19  }
  0x16   :  { %444 = vmatmul.msk.f32.gmra.mxu2 %vm23_vm0, %v22_v7 }
  0x19   :  { %435 = vmatmul.msk.f32.gmra.mxu0 %vm23_vm0, %v21_v17  ;;  %440 = vmatmul.msk.f32.gmra.mxu1 %vm23_vm0, %v20_v16 }
  0x79   :  { %v570_v20 = vpop.permute.xlu0 %93 }
  0x7a   :  { %vm104_vm6 = vcmp.eq.s32.totalorder %v570_v20, 1 }
  0x7c   :  { %v574_v22 = vpop.permute.xlu1 %99 }
  0x7d   :  { %vm106_vm13 = vcmp.eq.s32.totalorder %v574_v22, 1 }
  0x81   :  { %v584_v27 = vpop.permute.xlu0 %96 }
  0x82   :  { %vm105_vm9 = vcmp.eq.s32.totalorder %v584_v27, 1 }
  0x84   :  { %v591_v31 = vpop.permute.xlu1 %102 }
  0x85   :  { %vm107_vm11 = vcmp.eq.s32.totalorder %v591_v31, 1 }
  0x86   :  { %v572_v21 = vpop.f32.mrf.mxu0  ;;  %v580_v25 = vpop.f32.mrf.mxu1 }
  0x87   :  { %v80_v23 = vmul.f32 0.1, %v572_v21  ;;  %vm76_vm5 = vcmp.gt.f32.partialorder %v572_v21, 0.0  ;;  %v83_v30 = vmul.f32 0.1, %v580_v25  ;;  %vm79_vm8 = vcmp.gt.f32.partialorder %v580_v25, 0.0 }
  0x89   :  { %v84_v24 = vsel %vm76_vm5, %v572_v21, %v80_v23  ;;  %v87_v36 = vsel %vm79_vm8, %v580_v25, %v83_v30 }
  0x8a   :  { %v108_v26 = vsel %vm104_vm6, %v84_v24, 0.0  ;;  %v111_v40 = vsel %vm107_vm11, %v87_v36, 0.0 }
  0x8b   :  { %v112_v32 = vmul.f32 %v108_v26, %v108_v26  ;;  %v115_v44 = vmul.f32 %v111_v40, %v111_v40 }
  0x8d   :  { %v117_v37 = vsel %vm116_vm10, %v112_v32, 0.0  ;;  %v127_v50 = vsel %vm116_vm10, %v115_v44, 0.0 }
  0x8e   :  { %v586_v28 = vpop.f32.mrf.mxu0 }
  0x8f   :  { %vm77_vm7 = vcmp.gt.f32.partialorder %v586_v28, 0.0  ;;  %v81_v29 = vmul.f32 0.1, %v586_v28 }
  0x91   :  { %v85_v33 = vsel %vm77_vm7, %v586_v28, %v81_v29 }
  0x92   :  { %v109_v34 = vsel %vm105_vm9, %v85_v33, 0.0 }
  0x93   :  { %v113_v35 = vmul.f32 %v109_v34, %v109_v34 }
  0x95   :  { %v118_v38 = vsel %vm116_vm10, %v113_v35, 0.0 }
  0x96   :  { %v119_v39 = vadd.f32 %v118_v38, %v117_v37  ;;  %v604_v41 = vpop.f32.mrf.mxu0 }
  0x97   :  { %vm78_vm12 = vcmp.gt.f32.partialorder %v604_v41, 0.0  ;;  %v82_v42 = vmul.f32 0.1, %v604_v41 }
  0x98   :  { %v120_v43 = vrot.slane %v119_v39, 4 }
  0x99   :  { %v86_v45 = vsel %vm78_vm12, %v604_v41, %v82_v42 }
  0x9a   :  { %v121_v46 = vadd.f32 %v120_v43, %v119_v39  ;;  %v110_v47 = vsel %vm106_vm13, %v86_v45, 0.0 }
  0x9b   :  { %v114_v48 = vmul.f32 %v110_v47, %v110_v47 }
  0x9c   :  { %v122_v49 = vrot.slane %v121_v46, 2 }
  0x9d   :  { %v126_v51 = vsel %vm116_vm10, %v114_v48, 0.0 }
  0x9e   :  { %v123_v52 = vadd.f32 %v122_v49, %v121_v46  ;;  %v128_v53 = vadd.f32 %v127_v50, %v126_v51 }
  0xa0   :  { %v124_v54 = vrot.slane %v123_v52, 1  ;;  %v129_v55 = vrot.slane %v128_v53, 4 }
  0xa2   :  { %v125_v56 = vadd.f32 %v124_v54, %v123_v52  ;;  %v130_v57 = vadd.f32 %v129_v55, %v128_v53 }
  0xa4   :  { %v135_v58 = vadd.f32 1e-16, %v125_v56  ;;  %v131_v59 = vrot.slane %v130_v57, 2  ;;  %v242_v56 = vpop.f32.mrf.mxu1 }
  0xa6   :  { %459 = vrsqrt.f32 %v135_v58  ;;  %v132_v60 = vadd.f32 %v131_v59, %v130_v57  ;;  %vm143_vm15 = vweird.f32 %v135_v58 }
  0xa8   :  { %v133_v61 = vrot.slane %v132_v60, 1 }
  0xaa   :  { %v134_v62 = vadd.f32 %v133_v61, %v132_v60 }
  0xac   :  { %v460_v63 = vpop.eup %459  ;;  %v136_v0 = vadd.f32 1e-16, %v134_v62  ;;  %v245_v61 = vpop.f32.mrf.mxu1 }
  0xad   :  { %v138_v1 = vmul.f32 %v460_v63, %v135_v58  ;;  %vm144_vm14 = vweird.f32 %v460_v63 }
  0xae   :  { %461 = vrsqrt.f32 %v136_v0  ;;  %vm145_vm0 = vmor %vm143_vm15, %vm144_vm14  ;;  %vm153_vm2 = vweird.f32 %v136_v0 }
  0xaf   :  { %v139_v2 = vmul.f32 %v460_v63, %v138_v1  ;;  %v265_v1 = vpop.f32.mrf.mxu2 }
  0xb1   :  { %v140_v3 = vmul.f32 0.5, %v139_v2 }
  0xb3   :  { %v141_v4 = vsub.f32 1.5, %v140_v3 }
  0xb4   :  { %v462_v5 = vpop.eup %461 }
  0xb5   :  { %v142_v6 = vmul.f32 %v460_v63, %v141_v4  ;;  %v148_v7 = vmul.f32 %v462_v5, %v136_v0  ;;  %vm154_vm1 = vweird.f32 %v462_v5 }
  0xb6   :  { %vm155_vm3 = vmor %vm153_vm2, %vm154_vm1  ;;  %vm412_vm1 = vcmask 1041409   ;;  %vm415_vm2 = vcmask 189440  }
  0xb7   :  { %v146_v8 = vsel %vm145_vm0, %v460_v63, %v142_v6  ;;  %v149_v9 = vmul.f32 %v462_v5, %v148_v7  ;;  %v268_v3 = vpop.f32.mrf.mxu2 }
  0xb8   :  { %v157_v10 = vmul.f32 %v146_v8, %v108_v26  ;;  %v158_v11 = vmul.f32 %v146_v8, %v109_v34 }
  0xb9   :  { %v150_v12 = vmul.f32 0.5, %v149_v9 }
  0xba   :  { %v161_v13 = vmul.f32 10.0, %v157_v10  ;;  %v162_v14 = vmul.f32 10.0, %v158_v11 }
  0xbb   :  { %v151_v15 = vsub.f32 1.5, %v150_v12 }
  0xbc   :  { %v165_v16 = vmul.f32 1.442695, %v161_v13  ;;  %v167_v17 = vmul.f32 1.442695, %v162_v14 }
  0xbd   :  { %v152_v18 = vmul.f32 %v462_v5, %v151_v15 }
  0xbe   :  { %463 = vpow2.f32 %v165_v16 }
  0xbf   :  { %465 = vpow2.f32 %v167_v17  ;;  %v156_v19 = vsel %vm155_vm3, %v462_v5, %v152_v18 }
  0xc0   :  { %v159_v23 = vmul.f32 %v156_v19, %v110_v47  ;;  %v160_v24 = vmul.f32 %v156_v19, %v111_v40 }
  0xc2   :  { %v163_v29 = vmul.f32 10.0, %v159_v23  ;;  %v164_v30 = vmul.f32 10.0, %v160_v24 }
  0xc4   :  { %v464_v32 = vpop.eup %463  ;;  %v169_v26 = vmul.f32 1.442695, %v163_v29  ;;  %v171_v33 = vmul.f32 1.442695, %v164_v30 }
  0xc5   :  { %v466_v34 = vpop.eup %465  ;;  %v173_v35 = vsel %vm104_vm6, %v464_v32, 0.0 }
  0xc6   :  { %v174_v36 = vsel %vm105_vm9, %v466_v34, 0.0  ;;  %v177_v37 = vsel %vm116_vm10, %v173_v35, 0.0  ;;  %467 = vpow2.f32 %v169_v26 }
  0xc7   :  { %v178_v38 = vsel %vm116_vm10, %v174_v36, 0.0  ;;  %469 = vpow2.f32 %v171_v33 }
  0xc8   :  { %v179_v39 = vadd.f32 %v178_v38, %v177_v37 }
  0xca   :  { %v180_v40 = vrot.slane %v179_v39, 4 }
  0xcc   :  { %v468_v42 = vpop.eup %467  ;;  %v181_v43 = vadd.f32 %v180_v40, %v179_v39 }
  0xcd   :  { %v470_v44 = vpop.eup %469  ;;  %v175_v45 = vsel %vm106_vm13, %v468_v42, 0.0 }
  0xce   :  { %v182_v46 = vrot.slane %v181_v43, 2  ;;  %v176_v20 = vsel %vm107_vm11, %v470_v44, 0.0  ;;  %v186_v27 = vsel %vm116_vm10, %v175_v45, 0.0 }
  0xcf   :  { %v187_v47 = vsel %vm116_vm10, %v176_v20, 0.0 }
  0xd0   :  { %v183_v48 = vadd.f32 %v182_v46, %v181_v43  ;;  %v188_v49 = vadd.f32 %v187_v47, %v186_v27 }
  0xd2   :  { %v184_v50 = vrot.slane %v183_v48, 1  ;;  %v189_v51 = vrot.slane %v188_v49, 4 }
  0xd4   :  { %v185_v52 = vadd.f32 %v184_v50, %v183_v48  ;;  %v190_v53 = vadd.f32 %v189_v51, %v188_v49 }
  0xd6   :  { %v195_v54 = vadd.f32 1e-30, %v185_v52  ;;  %v191_v55 = vrot.slane %v190_v53, 2 }
  0xd8   :  { %471 = vrcp.f32 %v195_v54  ;;  %v192_v22 = vadd.f32 %v191_v55, %v190_v53 }
  0xda   :  { %v193_v57 = vrot.slane %v192_v22, 1 }
  0xdc   :  { %v194_v58 = vadd.f32 %v193_v57, %v192_v22 }
  0xde   :  { %v472_v59 = vpop.eup %471  ;;  %v196_v31 = vadd.f32 1e-30, %v194_v58 }
  0xdf   :  { %v626_v60 = vmul.f32 %v472_v59, %v174_v36  ;;  %v199_v62 = vmul.f32 %v472_v59, %v173_v35 }
  0xe0   :  { %473 = vrcp.f32 %v196_v31 }
  0xe1   :  { %292 = vmatpush.msrb.mxu2 %v626_v60  ;;  %453 = vmatpush.msra.mxu3 %v626_v60  ;;  %v204_v50 = vmul.f32 %v626_v60, %v586_v28  ;;  %v203_v52 = vmul.f32 %v199_v62, %v572_v21 }
  0xe3   :  { %293 = vmatpush.msrb.mxu2 %v199_v62  ;;  %454 = vmatpush.msra.mxu3 %v199_v62  ;;  %v207_v57 = vsel %vm116_vm10, %v203_v52, 0.0 }
  0xe4   :  { %445 = vmatmul.msk.f32.vlgmr.msrb.gmra.mxu2 %vm271_vm4, %v242_v56  ;;  %446 = vmatmul.msk.f32.vlgmr.msra.gmra.mxu3 %vm271_vm4, %v245_v61  ;;  %v208_v56 = vsel %vm116_vm10, %v204_v50, 0.0 }
  0xe5   :  { %v209_v28 = vadd.f32 %v208_v56, %v207_v57 }
  0xe6   :  { %v474_v63 = vpop.eup %473 }
  0xe7   :  { %v202_v0 = vmul.f32 %v474_v63, %v176_v20  ;;  %v201_v2 = vmul.f32 %v474_v63, %v175_v45 }
  0xe9   :  { %321 = vmatpush.msrb.mxu3 %v202_v0  ;;  %v205_v51 = vmul.f32 %v201_v2, %v604_v41  ;;  %v206_v53 = vmul.f32 %v202_v0, %v580_v25 }
  0xeb   :  { %322 = vmatpush.msrb.mxu3 %v201_v2  ;;  %v216_v22 = vsel %vm116_vm10, %v205_v51, 0.0  ;;  %v217_v58 = vsel %vm116_vm10, %v206_v53, 0.0 }
  0xec   :  { %447 = vmatmul.msk.f32.vlgmr.msrb.gmra.mxu3 %vm271_vm4, %v265_v1  ;;  %v218_v31 = vadd.f32 %v217_v58, %v216_v22 }
  0xee   :  { %v219_v21 = vrot.slane %v218_v31, 4 }
  0xf4   :  { %448 = vmatmul.msk.f32.gmra.mxu3 %vm271_vm4, %v268_v3  ;;  %v220_v3 = vadd.f32 %v219_v21, %v218_v31 }
 0x167   :  { %v295_v4 = vpop.f32.mrf.mxu2  ;;  %v298_v5 = vpop.f32.mrf.mxu3 }
 0x168   :  { %v330_v6 = vmul.f32 %v295_v4, %v199_v62  ;;  %v331_v7 = vmul.f32 %v298_v5, %v626_v60  ;;  %v210_v62 = vrot.slane %v209_v28, 4 }
 0x16a   :  { %v334_v8 = vsel %vm116_vm10, %v330_v6, 0.0  ;;  %v335_v9 = vsel %vm116_vm10, %v331_v7, 0.0  ;;  %v211_v4 = vadd.f32 %v210_v62, %v209_v28 }
 0x16b   :  { %v336_v10 = vadd.f32 %v335_v9, %v334_v8  ;;  %v221_v8 = vrot.slane %v220_v3, 2 }
 0x16c   :  { %v212_v7 = vrot.slane %v211_v4, 2 }
 0x16d   :  { %v337_v11 = vrot.slane %v336_v10, 4 }
 0x16f   :  { %v338_v12 = vadd.f32 %v337_v11, %v336_v10  ;;  %v324_v13 = vpop.f32.mrf.mxu3  ;;  %v213_v11 = vadd.f32 %v212_v7, %v211_v4 }
 0x170   :  { %v332_v17 = vmul.f32 %v324_v13, %v201_v2 }
 0x171   :  { %v339_v14 = vrot.slane %v338_v12, 2 }
 0x172   :  { %v343_v29 = vsel %vm116_vm10, %v332_v17, 0.0 }
 0x173   :  { %v340_v15 = vadd.f32 %v339_v14, %v338_v12  ;;  %v222_v12 = vadd.f32 %v221_v8, %v220_v3 }
 0x175   :  { %v341_v16 = vrot.slane %v340_v15, 1 }
 0x177   :  { %v342_v18 = vadd.f32 %v341_v16, %v340_v15  ;;  %v327_v19 = vpop.f32.mrf.mxu3 }
 0x178   :  { %v333_v23 = vmul.f32 %v327_v19, %v202_v0  ;;  %v223_v19 = vrot.slane %v222_v12, 1 }
 0x179   :  { %v352_v24 = vmax.f32 %v342_v18, 0.0  ;;  %v214_v18 = vrot.slane %v213_v11, 1 }
 0x17a   :  { %v344_v30 = vsel %vm116_vm10, %v333_v23, 0.0 }
 0x17b   :  { %475 = vrsqrt.f32 %v352_v24  ;;  %v345_v32 = vadd.f32 %v344_v30, %v343_v29  ;;  %vm361_vm5 = vcmp.eq.f32.partialorder %v352_v24, inf  ;;  %v364_v20 = vand.u32 2147483648, %v352_v24 }
 0x17c   :  { %vm363_vm6 = vcmp.eq.f32.partialorder %v352_v24, 0.0 }
 0x17d   :  { %v346_v26 = vrot.slane %v345_v32, 4 }
 0x17f   :  { %v347_v33 = vadd.f32 %v346_v26, %v345_v32 }
 0x181   :  { %v476_v34 = vpop.eup %475  ;;  %v348_v35 = vrot.slane %v347_v33, 2 }
 0x182   :  { %v355_v36 = vmul.f32 %v476_v34, %v352_v24 }
 0x183   :  { %v349_v37 = vadd.f32 %v348_v35, %v347_v33  ;;  %v215_v35 = vadd.f32 %v214_v18, %v213_v11 }
 0x184   :  { %v356_v38 = vmul.f32 %v476_v34, %v355_v36  ;;  %v224_v36 = vadd.f32 %v223_v19, %v222_v12 }
 0x185   :  { %v350_v39 = vrot.slane %v349_v37, 1 }
 0x186   :  { %v357_v40 = vmul.f32 0.5, %v356_v38 }
 0x187   :  { %v351_v42 = vadd.f32 %v350_v39, %v349_v37 }
 0x188   :  { %v358_v43 = vsub.f32 1.5, %v357_v40 }
 0x189   :  { %v353_v44 = vmax.f32 %v351_v42, 0.0 }
 0x18a   :  { %v359_v45 = vmul.f32 %v476_v34, %v358_v43 }
 0x18b   :  { %477 = vrsqrt.f32 %v353_v44  ;;  %vm373_vm7 = vcmp.eq.f32.partialorder %v353_v44, inf  ;;  %v376_v63 = vand.u32 2147483648, %v353_v44  ;;  %vm375_vm8 = vcmp.eq.f32.partialorder %v353_v44, 0.0 }
 0x18c   :  { %v360_v46 = vmul.f32 %v359_v45, %v352_v24 }
 0x18e   :  { %v362_v27 = vsel %vm361_vm5, %v352_v24, %v360_v46 }
 0x18f   :  { %v365_v47 = vsel %vm363_vm6, %v364_v20, %v362_v27 }
 0x190   :  { %v378_v48 = vadd.f32 -1e-08, %v365_v47 }
 0x191   :  { %v478_v49 = vpop.eup %477 }
 0x192   :  { %v367_v54 = vmul.f32 %v478_v49, %v353_v44  ;;  %479 = vrcp.f32 %v378_v48  ;;  %v391_v15 = vand.u32 2147483648, %v378_v48  ;;  %vm385_vm10 = vweird.f32 %v378_v48 }
 0x193   :  { %v389_v16 = vand.u32 2147483647, %v378_v48 }
 0x194   :  { %v368_v55 = vmul.f32 %v478_v49, %v367_v54  ;;  %v392_v32 = vor.u32 1.1754944e-38, %v391_v15 }
 0x195   :  { %vm390_vm13 = vcmp.eq.f32.partialorder %v389_v16, 8.507059e+37 }
 0x196   :  { %v369_v59 = vmul.f32 0.5, %v368_v55 }
 0x198   :  { %v370_v60 = vsub.f32 1.5, %v369_v59  ;;  %v480_v41 = vpop.eup %479 }
 0x199   :  { %v381_v0 = vmul.f32 %v480_v41, %v378_v48  ;;  %vm386_vm9 = vweird.f32 %v480_v41 }
 0x19a   :  { %v371_v61 = vmul.f32 %v478_v49, %v370_v60  ;;  %vm387_vm11 = vmor %vm385_vm10, %vm386_vm9 }
 0x19b   :  { %v382_v6 = vsub.f32 1.0, %v381_v0 }
 0x19c   :  { %v372_v25 = vmul.f32 %v371_v61, %v353_v44 }
 0x19d   :  { %v383_v9 = vmul.f32 %v480_v41, %v382_v6 }
 0x19e   :  { %v374_v1 = vsel %vm373_vm7, %v353_v44, %v372_v25 }
 0x19f   :  { %v377_v2 = vsel %vm375_vm8, %v376_v63, %v374_v1  ;;  %v384_v13 = vadd.f32 %v480_v41, %v383_v9 }
 0x1a0   :  { %v379_v5 = vadd.f32 -1e-08, %v377_v2 }
 0x1a1   :  { %v388_v24 = vsel %vm387_vm11, %v480_v41, %v384_v13 }
 0x1a2   :  { %481 = vrcp.f32 %v379_v5  ;;  %v406_v23 = vand.u32 2147483648, %v379_v5  ;;  %v404_v30 = vand.u32 2147483647, %v379_v5  ;;  %vm400_vm14 = vweird.f32 %v379_v5 }
 0x1a3   :  { %v393_v33 = vsel %vm390_vm13, %v392_v32, %v388_v24 }
 0x1a4   :  { %v407_v34 = vor.u32 1.1754944e-38, %v406_v23  ;;  %vm405_vm0 = vcmp.eq.f32.partialorder %v404_v30, 8.507059e+37  ;;  %v394_v39 = vmul.f32 %v393_v33, %v215_v35 }
 0x1a8   :  { %v482_v10 = vpop.eup %481 }
 0x1a9   :  { %v396_v14 = vmul.f32 %v482_v10, %v379_v5  ;;  %vm401_vm12 = vweird.f32 %v482_v10 }
 0x1aa   :  { %vm402_vm15 = vmor %vm400_vm14, %vm401_vm12 }
 0x1ab   :  { %v397_v17 = vsub.f32 1.0, %v396_v14 }
 0x1ad   :  { %v398_v29 = vmul.f32 %v482_v10, %v397_v17 }
 0x1af   :  { %v399_v26 = vadd.f32 %v482_v10, %v398_v29 }
 0x1b1   :  { %v403_v37 = vsel %vm402_vm15, %v482_v10, %v399_v26 }
 0x1b2   :  { %v408_v38 = vsel %vm405_vm0, %v407_v34, %v403_v37 }
 0x1b3   :  { %v409_v40 = vmul.f32 %v408_v38, %v224_v36 }
 0x1b5   :  { %v413_v42 = vsel %vm412_vm1, %v409_v40, %v394_v39 }
 0x1b6   :  { %416 = vst.msk [vmem:[#allocation2] sm:$0x3] %vm415_vm2, %v413_v42 }
 0x1b7   :  { %427 = dma.vmem_to_hbm [thread:$0]  %s423_s28, 32, %s425_s4, [#allocation3]  }
 0x1b8   :  { %507 = dma.done.wait [#allocation3], 32  }
 0x1b9   :  { %508 = vsyncadd [#allocation3], 4294967264 }
 0x1ba   :  { %432 = vsyncpa [#allocation3], 1 }

</bundles_post_ra>
